<compile_context>
chip_gen: v5e
topology: v5e:2x2
jax: 0.10.0
libtpu: 0.0.40
codegen_flags: <defaults>
</compile_context>

<pallas_src>
import functools
from typing import NamedTuple, Tuple

import jax
import jax.numpy as jnp
from jax.experimental import pallas as pl
from jax.experimental.pallas import tpu as pltpu

_LANE = 128  # lane width: feature dims padded to multiples of this


def _round_up(x, m):
    return ((x + m - 1) // m) * m


def _device_kind():
    try:
        return jax.devices()[0].device_kind.lower()
    except Exception:
        return ""


def _vmem_capacity_bytes():
    try:
        cap = int(pltpu.get_tpu_info().vmem_capacity_bytes)
        if cap > 0:
            return cap
    except Exception:
        pass
    # Conservative fallbacks: v7x has 64 MiB/TC, older generations 128 MiB.
    return 64 * 2**20 if "v7" in _device_kind() else 128 * 2**20


def _default_tile_b():
    kind = _device_kind()
    if "v6" in kind or "v7" in kind:
        return 256  # 256x256 MXU
    return 128      # v5e 128x128 MXU


def _relu_in_bf16():
    kind = _device_kind()
    return ("v6" in kind) or ("v7" in kind)


# --------------------------------------------------------------------------- #
# One-time parameter preparation (hoisted out of the per-call path).
# --------------------------------------------------------------------------- #
class PreparedMLP(NamedTuple):
    dims: Tuple[int, ...]      # logical layer boundary sizes (d_model, ..., num_classes)
    dims_p: Tuple[int, ...]    # 128-padded boundary sizes
    flat: Tuple[jax.Array, ...]  # (w0_p, b0_p, w1_p, b1_p, ...) bf16 / f32, padded


def prepare_mlp_params(params):
    """Pad + cast weights/biases once. params: list of (W (in,out) f32, b (out,) f32)."""
    dims = [params[0][0].shape[0]] + [w.shape[1] for w, _ in params]
    dims_p = [_round_up(d, _LANE) for d in dims]
    flat = []
    for i, (w, b) in enumerate(params):
        in_p, out_p = dims_p[i], dims_p[i + 1]
        w_p = jnp.zeros((in_p, out_p), jnp.bfloat16)
        w_p = w_p.at[: w.shape[0], : w.shape[1]].set(w.astype(jnp.bfloat16))
        b_p = jnp.zeros((1, out_p), jnp.float32)
        b_p = b_p.at[0, : b.shape[0]].set(b.astype(jnp.float32))
        flat += [w_p, b_p]
    return PreparedMLP(dims=tuple(dims), dims_p=tuple(dims_p), flat=tuple(flat))


# --------------------------------------------------------------------------- #
# Fused kernel: whole MLP per batch tile, all params resident in VMEM.
# --------------------------------------------------------------------------- #
def _mlp_fused_kernel(num_layers, relu_bf16, *refs):
    """refs = (x_ref, w0_ref, b0_ref, ..., o_ref). x/W bf16, b f32, out f32."""
    x_ref = refs[0]
    o_ref = refs[-1]
    p = refs[1:-1]

    h = x_ref[...]                                     # bf16 (tile_b, d_pad)
    for i in range(num_layers):
        w = p[2 * i][...]                              # bf16 (in_pad, out_pad)
        b = p[2 * i + 1][...]                          # f32  (1, out_pad)
        acc = jnp.dot(h, w, preferred_element_type=jnp.float32) + b
        if i < num_layers - 1:
            if relu_bf16:
                h = jnp.maximum(acc.astype(jnp.bfloat16), 0.0)   # bf16 VPU (v6e/v7x)
            else:
                h = jnp.maximum(acc, 0.0).astype(jnp.bfloat16)   # f32 VPU (v5e)
        else:
            h = acc
    o_ref[...] = h.astype(o_ref.dtype)


# --------------------------------------------------------------------------- #
# Layer-wise fallback: K-tiled matmul kernel with fused bias (+ ReLU) epilogue.
# --------------------------------------------------------------------------- #
def _linear_kernel(relu, x_ref, w_ref, b_ref, o_ref, acc_ref):
    @pl.when(pl.program_id(2) == 0)
    def _():
        acc_ref[...] = jnp.zeros_like(acc_ref)

    acc_ref[...] += jnp.dot(x_ref[...], w_ref[...], preferred_element_type=jnp.float32)

    @pl.when(pl.program_id(2) == pl.num_programs(2) - 1)
    def _():
        out = acc_ref[...] + b_ref[...]
        if relu:
            out = jnp.maximum(out, 0.0)
        o_ref[...] = out.astype(o_ref.dtype)


def _linear_layer(x_p, w_p, b_p, *, relu, out_dtype, tile_m, cap):
    m, k = x_p.shape
    _, n = w_p.shape
    tm = min(tile_m, m)
    tn = 256 if n % 256 == 0 else 128
    tn = min(tn, n)
    tk = 512 if k % 512 == 0 else (256 if k % 256 == 0 else 128)
    tk = min(tk, k)
    grid = (m // tm, n // tn, k // tk)

    out_size = jnp.dtype(out_dtype).itemsize
    need = (2 * (tm * tk * 2 + tk * tn * 2 + tn * 4)   # double-buffered inputs
            + 2 * tm * tn * out_size                    # double-buffered output
            + tm * tn * 4)                              # f32 accumulator
    vmem_limit = int(min(cap, max(need * 2, 32 * 2**20)))

    return pl.pallas_call(
        functools.partial(_linear_kernel, relu),
        out_shape=jax.ShapeDtypeStruct((m, n), out_dtype),
        grid=grid,
        in_specs=[pl.BlockSpec((tm, tk), lambda i, j, kk: (i, kk)),
                  pl.BlockSpec((tk, tn), lambda i, j, kk: (kk, j)),
                  pl.BlockSpec((1, tn), lambda i, j, kk: (0, j))],
        out_specs=pl.BlockSpec((tm, tn), lambda i, j, kk: (i, j)),
        scratch_shapes=[pltpu.VMEM((tm, tn), jnp.float32)],
        compiler_params=pltpu.CompilerParams(
            dimension_semantics=("parallel", "parallel", "arbitrary"),
            vmem_limit_bytes=vmem_limit),
    )(x_p, w_p, b_p)


# --------------------------------------------------------------------------- #
# Forward wrapper.
# --------------------------------------------------------------------------- #
def mlp_forward(x, prepared: PreparedMLP, *, tile_b=None, force_layerwise=False):
    """x: (batch, d_model) f32/bf16; prepared: output of prepare_mlp_params()."""
    batch, d_model = x.shape
    assert d_model == prepared.dims[0], (d_model, prepared.dims[0])
    num_layers = len(prepared.dims) - 1
    num_classes = prepared.dims[-1]
    dims_p = prepared.dims_p
    nc_p = dims_p[-1]
    kind = _device_kind()

    # --- batch tile selection (adaptive; MXU / sublane aligned) ---
    if tile_b is None:
        tile_b = min(_default_tile_b(), _round_up(batch, 16))
    tile_b = max(16, _round_up(tile_b, 16))
    b_pad = _round_up(max(batch, tile_b), tile_b)

    # v7x: make sure a sizeable batch lands on both TensorCores.
    if "v7" in kind and batch >= 64 and b_pad // tile_b < 2:
        tile_b = max(16, _round_up(b_pad // 2, 16))
        b_pad = _round_up(max(batch, tile_b), tile_b)

    # --- x: pad/cast only when actually needed ---
    if batch == b_pad and d_model == dims_p[0]:
        x_p = x if x.dtype == jnp.bfloat16 else x.astype(jnp.bfloat16)
    else:
        x_p = jnp.zeros((b_pad, dims_p[0]), jnp.bfloat16)
        x_p = x_p.at[:batch, :d_model].set(x.astype(jnp.bfloat16))

    # --- generation-aware VMEM budgeting ---
    param_bytes = sum(int(a.size) * a.dtype.itemsize for a in prepared.flat)
    max_d = max(dims_p)
    vmem_need = (2 * tile_b * dims_p[0] * 2      # double-buffered x tiles (bf16)
                 + 2 * tile_b * nc_p * 4         # double-buffered out tiles (f32)
                 + param_bytes                   # single-buffered resident params
                 + tile_b * max_d * 8)           # live activations (bf16 h + f32 acc)
    cap = int(0.85 * _vmem_capacity_bytes())
    use_fused = (not force_layerwise) and (vmem_need <= cap)

    if not use_fused:
        # Resident params would not fit: stream each layer as a K-tiled matmul.
        h = x_p
        for li in range(num_layers):
            last = (li == num_layers - 1)
            h = _linear_layer(
                h, prepared.flat[2 * li], prepared.flat[2 * li + 1],
                relu=not last,
                out_dtype=jnp.float32 if last else jnp.bfloat16,
                tile_m=tile_b, cap=cap)
        return h[:batch, :num_classes].astype(x.dtype)

    # --- fused path ---
    grid = (b_pad // tile_b,)
    vmem_limit = int(min(cap, max(vmem_need * 1.25, 32 * 2**20)))

    flops = 2 * sum(b_pad * dims_p[i] * dims_p[i + 1] for i in range(num_layers))
    bytes_accessed = int(x_p.size) * 2 + param_bytes + b_pad * nc_p * 4
    cost = pl.CostEstimate(flops=flops, transcendentals=0,
                           bytes_accessed=int(bytes_accessed))
    kernel = functools.partial(_mlp_fused_kernel, num_layers, _relu_in_bf16())

    def _run(single_buffer_params):
        in_specs = [pl.BlockSpec((tile_b, dims_p[0]), lambda i: (i, 0))]
        for li in range(num_layers):
            in_p, out_p = dims_p[li], dims_p[li + 1]
            if single_buffer_params:
                # Constant index_map across the grid -> single-buffer to save VMEM.
                in_specs.append(pl.BlockSpec((in_p, out_p), lambda i: (0, 0),
                                             pipeline_mode=pl.Buffered(1)))
                in_specs.append(pl.BlockSpec((1, out_p), lambda i: (0, 0),
                                             pipeline_mode=pl.Buffered(1)))
            else:
                in_specs.append(pl.BlockSpec((in_p, out_p), lambda i: (0, 0)))
                in_specs.append(pl.BlockSpec((1, out_p), lambda i: (0, 0)))
        out_specs = pl.BlockSpec((tile_b, nc_p), lambda i: (i, 0))
        return pl.pallas_call(
            kernel,
            out_shape=jax.ShapeDtypeStruct((b_pad, nc_p), jnp.float32),
            grid=grid,
            in_specs=in_specs,
            out_specs=out_specs,
            compiler_params=pltpu.CompilerParams(
                dimension_semantics=("parallel",),
                vmem_limit_bytes=vmem_limit),
            cost_estimate=cost,
        )(x_p, *prepared.flat)

    try:
        out_pad = _run(True)
    except Exception:
        # Safety net for jax versions without per-BlockSpec pipeline_mode support.
        out_pad = _run(False)

    return out_pad[:batch, :num_classes].astype(x.dtype)


# --------------------------------------------------------------------------- #
# Init + references.
# --------------------------------------------------------------------------- #
def init_mlp_params(key, d_model, num_classes, hidden_sizes=None):
    """Deterministic init matching the PyTorch module's layer shapes (W stored (in,out))."""
    sizes = [d_model] + (list(hidden_sizes) if hidden_sizes else []) + [num_classes]
    params = []
    for i in range(len(sizes) - 1):
        fan_in, fan_out = sizes[i], sizes[i + 1]
        key, kw, kb = jax.random.split(key, 3)
        bound = 1.0 / jnp.sqrt(fan_in)
        w = jax.random.uniform(kw, (fan_in, fan_out), jnp.float32, -bound, bound)
        b = jax.random.uniform(kb, (fan_out,), jnp.float32, -bound, bound)
        params.append((w, b))
    return params


def mlp_reference_bf16(x, params):
    """Pure-JAX reference matching the kernel's bf16-operand / f32-accumulate math."""
    h = x.astype(jnp.bfloat16)
    for i, (w, b) in enumerate(params):
        h = jnp.dot(h, w.astype(jnp.bfloat16), preferred_element_type=jnp.float32)
        h = h + b.astype(jnp.float32)
        if i < len(params) - 1:
            h = jnp.maximum(h, 0.0).astype(jnp.bfloat16)
    return h.astype(x.dtype)


def mlp_reference_f32(x, params):
    """Full-precision reference of the original module semantics (eval-mode dropout)."""
    h = x.astype(jnp.float32)
    for i, (w, b) in enumerate(params):
        h = h @ w + b
        if i < len(params) - 1:
            h = jnp.maximum(h, 0.0)
    return h.astype(x.dtype)


if __name__ == "__main__":
    key = jax.random.PRNGKey(0)

    # Config 1: hidden layers present, small batch (exercises adaptive small tile).
    batch, d_model, hidden_sizes, num_classes = 8, 32, [64, 32], 16
    key, kx = jax.random.split(key)
    x = jax.random.normal(kx, (batch, d_model), jnp.float32)
    params = init_mlp_params(key, d_model, num_classes, hidden_sizes)
    prepared = prepare_mlp_params(params)

    out = jax.block_until_ready(mlp_forward(x, prepared))
    assert out.shape == (batch, num_classes), out.shape
    assert jnp.allclose(out, mlp_reference_bf16(x, params), atol=5e-3, rtol=5e-3), \
        "mismatch vs bf16 reference (fused)"
    assert jnp.allclose(out, mlp_reference_f32(x, params), atol=1e-1, rtol=1e-1), \
        "mismatch vs f32 reference (fused)"

    # Same config via the layer-wise (K-tiled) fallback path.
    out_lw = jax.block_until_ready(mlp_forward(x, prepared, force_layerwise=True))
    assert jnp.allclose(out_lw, mlp_reference_bf16(x, params), atol=5e-3, rtol=5e-3), \
        "mismatch vs bf16 reference (layerwise)"

    # Config 2: hidden_sizes=None (single Linear head path of the module).
    key, kx2 = jax.random.split(key)
    x2 = jax.random.normal(kx2, (batch, d_model), jnp.float32)
    params2 = init_mlp_params(key, d_model, num_classes, None)
    prepared2 = prepare_mlp_params(params2)
    out2 = jax.block_until_ready(mlp_forward(x2, prepared2))
    assert out2.shape == (batch, num_classes), out2.shape
    assert jnp.allclose(out2, mlp_reference_bf16(x2, params2), atol=5e-3, rtol=5e-3)

    # Config 3: aligned shapes (batch % tile == 0, d_model % 128 == 0) -> no x padding copy.
    batch3, d_model3 = 128, 128
    key, kx3 = jax.random.split(key)
    x3 = jax.random.normal(kx3, (batch3, d_model3), jnp.float32)
    params3 = init_mlp_params(key, d_model3, num_classes, [256])
    prepared3 = prepare_mlp_params(params3)
    out3 = jax.block_until_ready(mlp_forward(x3, prepared3))
    assert out3.shape == (batch3, num_classes), out3.shape
    assert jnp.allclose(out3, mlp_reference_bf16(x3, params3), atol=5e-3, rtol=5e-3)

    print("KERNEL_OK")
</pallas_src>

<mosaic_0001>
module attributes {stable_mosaic.version = 11 : i64} {
  func.func @_mlp_fused_kernel(%arg0: i32, %arg1: memref<16x128xbf16, #tpu.memory_space<vmem>>, %arg2: memref<128x128xbf16, #tpu.memory_space<vmem>>, %arg3: memref<1x128xf32, #tpu.memory_space<vmem>>, %arg4: memref<128x128xbf16, #tpu.memory_space<vmem>>, %arg5: memref<1x128xf32, #tpu.memory_space<vmem>>, %arg6: memref<128x128xbf16, #tpu.memory_space<vmem>>, %arg7: memref<1x128xf32, #tpu.memory_space<vmem>>, %arg8: memref<16x128xf32, #tpu.memory_space<vmem>>) attributes {dimension_semantics = [#tpu.dimension_semantics<parallel>], iteration_bounds = array<i64: 1>, scalar_prefetch = 0 : i64, scratch_operands = 0 : i64, tpu.core_type = #tpu.core_type<tc>, window_params = [{transform_indices = @transform_0, window_bounds = array<i64: 16, 128>}, {pipeline_mode = #tpu.pipeline_mode<synchronous>, transform_indices = @transform_1, window_bounds = array<i64: 128, 128>}, {pipeline_mode = #tpu.pipeline_mode<synchronous>, transform_indices = @transform_2, window_bounds = array<i64: 1, 128>}, {pipeline_mode = #tpu.pipeline_mode<synchronous>, transform_indices = @transform_3, window_bounds = array<i64: 128, 128>}, {pipeline_mode = #tpu.pipeline_mode<synchronous>, transform_indices = @transform_4, window_bounds = array<i64: 1, 128>}, {pipeline_mode = #tpu.pipeline_mode<synchronous>, transform_indices = @transform_5, window_bounds = array<i64: 128, 128>}, {pipeline_mode = #tpu.pipeline_mode<synchronous>, transform_indices = @transform_6, window_bounds = array<i64: 1, 128>}, {transform_indices = @transform_7, window_bounds = array<i64: 16, 128>}]} {
    %c0 = arith.constant 0 : index
    %c0_0 = arith.constant 0 : index
    %0 = vector.load %arg1[%c0, %c0_0] : memref<16x128xbf16, #tpu.memory_space<vmem>>, vector<16x128xbf16>
    %c0_1 = arith.constant 0 : index
    %c0_2 = arith.constant 0 : index
    %1 = vector.load %arg2[%c0_1, %c0_2] : memref<128x128xbf16, #tpu.memory_space<vmem>>, vector<128x128xbf16>
    %c0_3 = arith.constant 0 : index
    %c0_4 = arith.constant 0 : index
    %2 = vector.load %arg3[%c0_3, %c0_4] : memref<1x128xf32, #tpu.memory_space<vmem>>, vector<1x128xf32>
    %cst = arith.constant dense<0.000000e+00> : vector<16x128xf32>
    %3 = tpu.matmul %0, %1, %cst {dimension_numbers = #tpu.dot_dimension_numbers<[1], [0], [0], [1], [0, 0, 1, 1], [], []>} : vector<16x128xbf16>, vector<128x128xbf16>, vector<16x128xf32> -> vector<16x128xf32>
    %4 = vector.broadcast %2 : vector<1x128xf32> to vector<16x128xf32>
    %5 = arith.addf %3, %4 : vector<16x128xf32>
    %cst_5 = arith.constant 0.000000e+00 : f32
    %6 = vector.broadcast %cst_5 : f32 to vector<16x128xf32>
    %7 = arith.maximumf %5, %6 : vector<16x128xf32>
    %8 = arith.truncf %7 : vector<16x128xf32> to vector<16x128xbf16>
    %c0_6 = arith.constant 0 : index
    %c0_7 = arith.constant 0 : index
    %9 = vector.load %arg4[%c0_6, %c0_7] : memref<128x128xbf16, #tpu.memory_space<vmem>>, vector<128x128xbf16>
    %c0_8 = arith.constant 0 : index
    %c0_9 = arith.constant 0 : index
    %10 = vector.load %arg5[%c0_8, %c0_9] : memref<1x128xf32, #tpu.memory_space<vmem>>, vector<1x128xf32>
    %cst_10 = arith.constant dense<0.000000e+00> : vector<16x128xf32>
    %11 = tpu.matmul %8, %9, %cst_10 {dimension_numbers = #tpu.dot_dimension_numbers<[1], [0], [0], [1], [0, 0, 1, 1], [], []>} : vector<16x128xbf16>, vector<128x128xbf16>, vector<16x128xf32> -> vector<16x128xf32>
    %12 = vector.broadcast %10 : vector<1x128xf32> to vector<16x128xf32>
    %13 = arith.addf %11, %12 : vector<16x128xf32>
    %cst_11 = arith.constant 0.000000e+00 : f32
    %14 = vector.broadcast %cst_11 : f32 to vector<16x128xf32>
    %15 = arith.maximumf %13, %14 : vector<16x128xf32>
    %16 = arith.truncf %15 : vector<16x128xf32> to vector<16x128xbf16>
    %c0_12 = arith.constant 0 : index
    %c0_13 = arith.constant 0 : index
    %17 = vector.load %arg6[%c0_12, %c0_13] : memref<128x128xbf16, #tpu.memory_space<vmem>>, vector<128x128xbf16>
    %c0_14 = arith.constant 0 : index
    %c0_15 = arith.constant 0 : index
    %18 = vector.load %arg7[%c0_14, %c0_15] : memref<1x128xf32, #tpu.memory_space<vmem>>, vector<1x128xf32>
    %cst_16 = arith.constant dense<0.000000e+00> : vector<16x128xf32>
    %19 = tpu.matmul %16, %17, %cst_16 {dimension_numbers = #tpu.dot_dimension_numbers<[1], [0], [0], [1], [0, 0, 1, 1], [], []>} : vector<16x128xbf16>, vector<128x128xbf16>, vector<16x128xf32> -> vector<16x128xf32>
    %20 = vector.broadcast %18 : vector<1x128xf32> to vector<16x128xf32>
    %21 = arith.addf %19, %20 : vector<16x128xf32>
    %c0_17 = arith.constant 0 : index
    %c0_18 = arith.constant 0 : index
    %22 = vector.load %arg8[%c0_17, %c0_18] : memref<16x128xf32, #tpu.memory_space<vmem>>, vector<16x128xf32>
    tpu.vector_store %arg8[%c0_17, %c0_18], %21 {strides = array<i32>} : memref<16x128xf32, #tpu.memory_space<vmem>>, vector<16x128xf32>,
    return
  }
  func.func @transform_0(%arg0: i32) -> (i32, i32) {
    %c0_i32 = arith.constant 0 : i32
    %c0_i32_0 = arith.constant 0 : i32
    return %arg0, %c0_i32 : i32, i32
  }
  func.func @transform_1(%arg0: i32) -> (i32, i32) {
    %c0_i32 = arith.constant 0 : i32
    %c0_i32_0 = arith.constant 0 : i32
    %c0_i32_1 = arith.constant 0 : i32
    return %c0_i32, %c0_i32_0 : i32, i32
  }
  func.func @transform_2(%arg0: i32) -> (i32, i32) {
    %c0_i32 = arith.constant 0 : i32
    %c0_i32_0 = arith.constant 0 : i32
    %c0_i32_1 = arith.constant 0 : i32
    return %c0_i32, %c0_i32_0 : i32, i32
  }
  func.func @transform_3(%arg0: i32) -> (i32, i32) {
    %c0_i32 = arith.constant 0 : i32
    %c0_i32_0 = arith.constant 0 : i32
    %c0_i32_1 = arith.constant 0 : i32
    return %c0_i32, %c0_i32_0 : i32, i32
  }
  func.func @transform_4(%arg0: i32) -> (i32, i32) {
    %c0_i32 = arith.constant 0 : i32
    %c0_i32_0 = arith.constant 0 : i32
    %c0_i32_1 = arith.constant 0 : i32
    return %c0_i32, %c0_i32_0 : i32, i32
  }
  func.func @transform_5(%arg0: i32) -> (i32, i32) {
    %c0_i32 = arith.constant 0 : i32
    %c0_i32_0 = arith.constant 0 : i32
    %c0_i32_1 = arith.constant 0 : i32
    return %c0_i32, %c0_i32_0 : i32, i32
  }
  func.func @transform_6(%arg0: i32) -> (i32, i32) {
    %c0_i32 = arith.constant 0 : i32
    %c0_i32_0 = arith.constant 0 : i32
    %c0_i32_1 = arith.constant 0 : i32
    return %c0_i32, %c0_i32_0 : i32, i32
  }
  func.func @transform_7(%arg0: i32) -> (i32, i32) {
    %c0_i32 = arith.constant 0 : i32
    %c0_i32_0 = arith.constant 0 : i32
    return %arg0, %c0_i32 : i32, i32
  }
}

module attributes {stable_mosaic.version = 11 : i64} {
  func.func @_mlp_fused_kernel(%arg0: i32, %arg1: memref<16x128xbf16, #tpu.memory_space<vmem>>, %arg2: memref<128x128xbf16, #tpu.memory_space<vmem>>, %arg3: memref<1x128xf32, #tpu.memory_space<vmem>>, %arg4: memref<128x128xbf16, #tpu.memory_space<vmem>>, %arg5: memref<1x128xf32, #tpu.memory_space<vmem>>, %arg6: memref<128x128xbf16, #tpu.memory_space<vmem>>, %arg7: memref<1x128xf32, #tpu.memory_space<vmem>>, %arg8: memref<16x128xf32, #tpu.memory_space<vmem>>) attributes {dimension_semantics = [#tpu.dimension_semantics<parallel>], iteration_bounds = array<i64: 1>, scalar_prefetch = 0 : i64, scratch_operands = 0 : i64, tpu.core_type = #tpu.core_type<tc>, window_params = [{transform_indices = @transform_0, window_bounds = array<i64: 16, 128>}, {pipeline_mode = #tpu.pipeline_mode<synchronous>, transform_indices = @transform_1, window_bounds = array<i64: 128, 128>}, {pipeline_mode = #tpu.pipeline_mode<synchronous>, transform_indices = @transform_2, window_bounds = array<i64: 1, 128>}, {pipeline_mode = #tpu.pipeline_mode<synchronous>, transform_indices = @transform_3, window_bounds = array<i64: 128, 128>}, {pipeline_mode = #tpu.pipeline_mode<synchronous>, transform_indices = @transform_4, window_bounds = array<i64: 1, 128>}, {pipeline_mode = #tpu.pipeline_mode<synchronous>, transform_indices = @transform_5, window_bounds = array<i64: 128, 128>}, {pipeline_mode = #tpu.pipeline_mode<synchronous>, transform_indices = @transform_6, window_bounds = array<i64: 1, 128>}, {transform_indices = @transform_7, window_bounds = array<i64: 16, 128>}]} {
    %c0 = arith.constant 0 : index
    %c0_0 = arith.constant 0 : index
    %0 = vector.load %arg1[%c0, %c0_0] : memref<16x128xbf16, #tpu.memory_space<vmem>>, vector<16x128xbf16>
    %c0_1 = arith.constant 0 : index
    %c0_2 = arith.constant 0 : index
    %1 = vector.load %arg2[%c0_1, %c0_2] : memref<128x128xbf16, #tpu.memory_space<vmem>>, vector<128x128xbf16>
    %c0_3 = arith.constant 0 : index
    %c0_4 = arith.constant 0 : index
    %2 = vector.load %arg3[%c0_3, %c0_4] : memref<1x128xf32, #tpu.memory_space<vmem>>, vector<1x128xf32>
    %cst = arith.constant dense<0.000000e+00> : vector<16x128xf32>
    %3 = tpu.matmul %0, %1, %cst {dimension_numbers = #tpu.dot_dimension_numbers<[1], [0], [0], [1], [0, 0, 1, 1], [], []>} : vector<16x128xbf16>, vector<128x128xbf16>, vector<16x128xf32> -> vector<16x128xf32>
    %4 = vector.broadcast %2 : vector<1x128xf32> to vector<16x128xf32>
    %5 = arith.addf %3, %4 : vector<16x128xf32>
    %cst_5 = arith.constant 0.000000e+00 : f32
    %6 = vector.broadcast %cst_5 : f32 to vector<16x128xf32>
    %7 = arith.maximumf %5, %6 : vector<16x128xf32>
    %8 = arith.truncf %7 : vector<16x128xf32> to vector<16x128xbf16>
    %c0_6 = arith.constant 0 : index
    %c0_7 = arith.constant 0 : index
    %9 = vector.load %arg4[%c0_6, %c0_7] : memref<128x128xbf16, #tpu.memory_space<vmem>>, vector<128x128xbf16>
    %c0_8 = arith.constant 0 : index
    %c0_9 = arith.constant 0 : index
    %10 = vector.load %arg5[%c0_8, %c0_9] : memref<1x128xf32, #tpu.memory_space<vmem>>, vector<1x128xf32>
    %cst_10 = arith.constant dense<0.000000e+00> : vector<16x128xf32>
    %11 = tpu.matmul %8, %9, %cst_10 {dimension_numbers = #tpu.dot_dimension_numbers<[1], [0], [0], [1], [0, 0, 1, 1], [], []>} : vector<16x128xbf16>, vector<128x128xbf16>, vector<16x128xf32> -> vector<16x128xf32>
    %12 = vector.broadcast %10 : vector<1x128xf32> to vector<16x128xf32>
    %13 = arith.addf %11, %12 : vector<16x128xf32>
    %cst_11 = arith.constant 0.000000e+00 : f32
    %14 = vector.broadcast %cst_11 : f32 to vector<16x128xf32>
    %15 = arith.maximumf %13, %14 : vector<16x128xf32>
    %16 = arith.truncf %15 : vector<16x128xf32> to vector<16x128xbf16>
    %c0_12 = arith.constant 0 : index
    %c0_13 = arith.constant 0 : index
    %17 = vector.load %arg6[%c0_12, %c0_13] : memref<128x128xbf16, #tpu.memory_space<vmem>>, vector<128x128xbf16>
    %c0_14 = arith.constant 0 : index
    %c0_15 = arith.constant 0 : index
    %18 = vector.load %arg7[%c0_14, %c0_15] : memref<1x128xf32, #tpu.memory_space<vmem>>, vector<1x128xf32>
    %cst_16 = arith.constant dense<0.000000e+00> : vector<16x128xf32>
    %19 = tpu.matmul %16, %17, %cst_16 {dimension_numbers = #tpu.dot_dimension_numbers<[1], [0], [0], [1], [0, 0, 1, 1], [], []>} : vector<16x128xbf16>, vector<128x128xbf16>, vector<16x128xf32> -> vector<16x128xf32>
    %20 = vector.broadcast %18 : vector<1x128xf32> to vector<16x128xf32>
    %21 = arith.addf %19, %20 : vector<16x128xf32>
    %c0_17 = arith.constant 0 : index
    %c0_18 = arith.constant 0 : index
    %22 = vector.load %arg8[%c0_17, %c0_18] : memref<16x128xf32, #tpu.memory_space<vmem>>, vector<16x128xf32>
    tpu.vector_store %arg8[%c0_17, %c0_18], %21 {strides = array<i32>} : memref<16x128xf32, #tpu.memory_space<vmem>>, vector<16x128xf32>,
    return
  }
  func.func @transform_0(%arg0: i32) -> (i32, i32) {
    %c0_i32 = arith.constant 0 : i32
    %c0_i32_0 = arith.constant 0 : i32
    return %arg0, %c0_i32 : i32, i32
  }
  func.func @transform_1(%arg0: i32) -> (i32, i32) {
    %c0_i32 = arith.constant 0 : i32
    %c0_i32_0 = arith.constant 0 : i32
    %c0_i32_1 = arith.constant 0 : i32
    return %c0_i32, %c0_i32_0 : i32, i32
  }
  func.func @transform_2(%arg0: i32) -> (i32, i32) {
    %c0_i32 = arith.constant 0 : i32
    %c0_i32_0 = arith.constant 0 : i32
    %c0_i32_1 = arith.constant 0 : i32
    return %c0_i32, %c0_i32_0 : i32, i32
  }
  func.func @transform_3(%arg0: i32) -> (i32, i32) {
    %c0_i32 = arith.constant 0 : i32
    %c0_i32_0 = arith.constant 0 : i32
    %c0_i32_1 = arith.constant 0 : i32
    return %c0_i32, %c0_i32_0 : i32, i32
  }
  func.func @transform_4(%arg0: i32) -> (i32, i32) {
    %c0_i32 = arith.constant 0 : i32
    %c0_i32_0 = arith.constant 0 : i32
    %c0_i32_1 = arith.constant 0 : i32
    return %c0_i32, %c0_i32_0 : i32, i32
  }
  func.func @transform_5(%arg0: i32) -> (i32, i32) {
    %c0_i32 = arith.constant 0 : i32
    %c0_i32_0 = arith.constant 0 : i32
    %c0_i32_1 = arith.constant 0 : i32
    return %c0_i32, %c0_i32_0 : i32, i32
  }
  func.func @transform_6(%arg0: i32) -> (i32, i32) {
    %c0_i32 = arith.constant 0 : i32
    %c0_i32_0 = arith.constant 0 : i32
    %c0_i32_1 = arith.constant 0 : i32
    return %c0_i32, %c0_i32_0 : i32, i32
  }
  func.func @transform_7(%arg0: i32) -> (i32, i32) {
    %c0_i32 = arith.constant 0 : i32
    %c0_i32_0 = arith.constant 0 : i32
    return %arg0, %c0_i32 : i32, i32
  }
}

</mosaic_0001>

<bundles_post_ra>
// kernel: tpu_custom_call.1
= control target key start
LH: loop header
LB: loop body
LE: loop exit
PB: predicated region body
PF: predicated region fallthrough
CT: control target
= control target key end

     0   :  { %12 = vsyncpa [#allocation3], 0  ;;  %s711_s0 = inlined_call_operand.hbm [shape: bf16[16,128], index: 0, kind: input, shape index: {}]   ;;  %s712_s1 = inlined_call_operand.hbm [shape: bf16[128,128], index: 1, kind: input, shape index: {}]   ;;  %s713_s2 = inlined_call_operand.vmem [shape: f32[1,128], index: 2, kind: input, shape index: {}]   ;;  %s714_s3 = inlined_call_operand.hbm [shape: bf16[128,128], index: 3, kind: input, shape index: {}]   ;;  %s715_s4 = inlined_call_operand.vmem [shape: f32[1,128], index: 4, kind: input, shape index: {}]   ;;  %s716_s5 = inlined_call_operand.hbm [shape: bf16[128,128], index: 5, kind: input, shape index: {}]   ;;  %s717_s6 = inlined_call_operand.vmem [shape: f32[1,128], index: 6, kind: input, shape index: {}]   ;;  %s718_s7 = inlined_call_operand.hbm [shape: f32[16,128], index: 7, kind: output, shape index: {}]  }
   0x1   :  { %13 = vsyncpa [#allocation6], 0 }
   0x2   :  { %14 = vsyncpa [#allocation9], 0 }
   0x3   :  { %15 = vsyncpa [#allocation4], 0  ;;  %s33_s26 = sshll.u32 %s712_s1, 4  ;;  %s638_s27 = smov [#allocation5]   ;;  %s34_s26 = int_to_ptr.hbm [resolvable:$true] %s33_s26 }
   0x4   :  { %s35_s28 = sshll.u32 %s638_s27, 4  ;;  %s20_s8 = sshll.u32 %s711_s0, 4  ;;  %s36_s28 = int_to_ptr.vmem [resolvable:$true] %s35_s28  ;;  %s21_s8 = int_to_ptr.hbm [resolvable:$true] %s20_s8 }
   0x5   :  { %s639_s9 = smov 64   ;;  %s640_s10 = smov 4  }
   0x6   :  { %41 = dma.hbm_to_vmem [thread:$0]  %s34_s26, 1024, %s36_s28, [#allocation6], %s639_s9, %s639_s9, %s640_s10  }
   0x7   :  { %s641_s11 = smov [#allocation2]   ;;  %s48_s15 = sshll.u32 %s714_s3, 4  ;;  %s49_s15 = int_to_ptr.hbm [resolvable:$true] %s48_s15 }
   0x8   :  { %s22_s12 = sshll.u32 %s641_s11, 4  ;;  %s63_s17 = sshll.u32 %s716_s5, 4  ;;  %s23_s12 = int_to_ptr.vmem [resolvable:$true] %s22_s12  ;;  %s64_s17 = int_to_ptr.hbm [resolvable:$true] %s63_s17 }
   0x9   :  { %28 = dma.hbm_to_vmem [thread:$0]  %s21_s8, 128, %s23_s12, [#allocation3], %s639_s9, %s639_s9, %s640_s10  }
   0xa   :  { %s642_s18 = smov [#allocation7]   ;;  %s643_s0 = smov [#allocation8]  }
   0xb   :  { %s50_s19 = sshll.u32 %s642_s18, 4  ;;  %s65_s20 = sshll.u32 %s643_s0, 4  ;;  %s51_s19 = int_to_ptr.vmem [resolvable:$true] %s50_s19  ;;  %s66_s20 = int_to_ptr.vmem [resolvable:$true] %s65_s20 }
   0xc   :  { %56 = dma.hbm_to_vmem [thread:$0]  %s49_s15, 1024, %s51_s19, [#allocation6], %s639_s9, %s639_s9, %s640_s10  }
   0xd   :  { %71 = dma.hbm_to_vmem [thread:$0]  %s64_s17, 1024, %s66_s20, [#allocation9], %s639_s9, %s639_s9, %s640_s10  }
   0xe   :  { %630 = dma.done.wait [#allocation3], 128  }
   0xf   :  { %631 = vsyncadd [#allocation3], 4294967168 }
  0x10   :  { %632 = dma.done.wait [#allocation6], 2048  }
  0x11   :  { %633 = vsyncadd [#allocation6], 4294965248 }
  0x12   :  { %634 = dma.done.wait [#allocation9], 1024  }
  0x13   :  { %635 = vsyncadd [#allocation9], 4294966272  ;;  %v481_v0 = vld [vmem:[#allocation5 + $0x38] sm:$0xff]  ;;  %v480_v1 = vld [vmem:[#allocation5 + $0x30] sm:$0xff]  ;;  %s644_s24 = smov [#allocation10]   ;;  %s645_s28 = smov 128  }
  0x14   :  { %166 = vmatpush.bf16.msra.mxu0 %v481_v0  ;;  %v489_v2 = vld [vmem:[#allocation7 + $0x38] sm:$0xff]  ;;  %v488_v3 = vld [vmem:[#allocation7 + $0x30] sm:$0xff]  ;;  %v479_v4 = vld [vmem:[#allocation5 + $0x28] sm:$0xff]  ;;  %s356_s25 = sshll.u32 %s644_s24, 4  ;;  %s646_s29 = smov 8   ;;  %s357_s25 = int_to_ptr.vmem [resolvable:$true] %s356_s25 }
  0x15   :  { %251 = vmatpush.bf16.msra.mxu1 %v489_v2  ;;  %v487_v5 = vld [vmem:[#allocation7 + $0x28] sm:$0xff]  ;;  %v478_v6 = vld [vmem:[#allocation5 + $0x20] sm:$0xff]  ;;  %v477_v8 = vld [vmem:[#allocation5 + $0x18] sm:$0xff] }
  0x16   :  { %v486_v7 = vld [vmem:[#allocation7 + $0x20] sm:$0xff]  ;;  %v476_v9 = vld [vmem:[#allocation5 + $0x10] sm:$0xff]  ;;  %v475_v10 = vld [vmem:[#allocation5 + $0x8] sm:$0xff] }
  0x17   :  { %v474_v11 = vld [vmem:[#allocation5] sm:$0xff]  ;;  %v473_v12 = vld [vmem:[#allocation2] sm:$0xff]  ;;  %v484_v14 = vld [vmem:[#allocation7 + $0x10] sm:$0xff] }
  0x18   :  { %167 = vmatpush.bf16.msra.mxu0 %v480_v1  ;;  %v485_v13 = vld [vmem:[#allocation7 + $0x18] sm:$0xff]  ;;  %v483_v15 = vld [vmem:[#allocation7 + $0x8] sm:$0xff]  ;;  %v482_v16 = vld [vmem:[#allocation7] sm:$0xff] }
  0x19   :  { %252 = vmatpush.bf16.msra.mxu1 %v488_v3  ;;  %v497_v17 = vld [vmem:[#allocation8 + $0x38] sm:$0xff]  ;;  %v496_v18 = vld [vmem:[#allocation8 + $0x30] sm:$0xff]  ;;  %v495_v19 = vld [vmem:[#allocation8 + $0x28] sm:$0xff] }
  0x1a   :  { %336 = vmatpush.bf16.msra.mxu2 %v497_v17  ;;  %v494_v20 = vld [vmem:[#allocation8 + $0x20] sm:$0xff]  ;;  %v507_v22 = vld [vmem:[%s713_s2] ss:$0 sm:$0xff]  ;;  %v492_v30 = vld [vmem:[#allocation8 + $0x10] sm:$0xff] }
  0x1b   :  { %v493_v29 = vld [vmem:[#allocation8 + $0x18] sm:$0xff]  ;;  %v491_v31 = vld [vmem:[#allocation8 + $0x8] sm:$0xff]  ;;  %v490_v32 = vld [vmem:[#allocation8] sm:$0xff] }
  0x1c   :  { %168 = vmatpush.bf16.msra.mxu0 %v479_v4  ;;  %v508_v34 = vld [vmem:[%s715_s4] ss:$0 sm:$0xff]  ;;  %s358_s4 = sshll.u32 %s718_s7, 4  ;;  %s359_s4 = int_to_ptr.hbm [resolvable:$true] %s358_s4 }
  0x1d   :  { %253 = vmatpush.bf16.msra.mxu1 %v487_v5  ;;  %v509_v41 = vld [vmem:[%s717_s6] ss:$0 sm:$0xff] }
  0x1e   :  { %337 = vmatpush.bf16.msra.mxu2 %v496_v18 }
  0x20   :  { %169 = vmatpush.bf16.msra.mxu0 %v478_v6 }
  0x21   :  { %254 = vmatpush.bf16.msra.mxu1 %v486_v7 }
  0x22   :  { %338 = vmatpush.bf16.msra.mxu2 %v495_v19 }
  0x24   :  { %170 = vmatpush.bf16.msra.mxu0 %v477_v8 }
  0x25   :  { %255 = vmatpush.bf16.msra.mxu1 %v485_v13 }
  0x26   :  { %339 = vmatpush.bf16.msra.mxu2 %v494_v20 }
  0x28   :  { %171 = vmatpush.bf16.msra.mxu0 %v476_v9 }
  0x29   :  { %256 = vmatpush.bf16.msra.mxu1 %v484_v14 }
  0x2a   :  { %340 = vmatpush.bf16.msra.mxu2 %v493_v29 }
  0x2c   :  { %172 = vmatpush.bf16.msra.mxu0 %v475_v10 }
  0x2d   :  { %257 = vmatpush.bf16.msra.mxu1 %v483_v15 }
  0x2e   :  { %341 = vmatpush.bf16.msra.mxu2 %v492_v30 }
  0x30   :  { %173 = vmatpush.bf16.msra.mxu0 %v474_v11 }
  0x31   :  { %258 = vmatpush.bf16.msra.mxu1 %v482_v16 }
  0x32   :  { %342 = vmatpush.bf16.msra.mxu2 %v491_v31 }
  0x33   :  { %174 = vmatmul.bf16.vlgmr.msra.gmra.mxu0 %v473_v12 }
  0x36   :  { %343 = vmatpush.bf16.msra.mxu2 %v490_v32 }
  0xb0   :  { %v175_v21 = vpop.f32.mrf.mxu0 }
  0xb1   :  { %v176_v23 = vadd.f32 %v507_v22, %v175_v21 }
  0xb3   :  { %v180_v26 = vmax.f32 %v176_v23, 0.0 }
  0xb8   :  { %v177_v24 = vpop.f32.mrf.mxu0 }
  0xb9   :  { %v178_v25 = vadd.f32 %v507_v22, %v177_v24 }
  0xbb   :  { %v181_v27 = vmax.f32 %v178_v25, 0.0 }
  0xbd   :  { %v182_v28 = vpack.c.bf16 %v181_v27, %v180_v26 }
  0xbf   :  { %259 = vmatmul.bf16.vlgmr.msra.gmra.mxu1 %v182_v28 }
 0x13c   :  { %v260_v33 = vpop.f32.mrf.mxu1 }
 0x13d   :  { %v261_v35 = vadd.f32 %v508_v34, %v260_v33 }
 0x13f   :  { %v265_v38 = vmax.f32 %v261_v35, 0.0 }
 0x144   :  { %v262_v36 = vpop.f32.mrf.mxu1 }
 0x145   :  { %v263_v37 = vadd.f32 %v508_v34, %v262_v36 }
 0x147   :  { %v266_v39 = vmax.f32 %v263_v37, 0.0 }
 0x149   :  { %v267_v40 = vpack.c.bf16 %v266_v39, %v265_v38 }
 0x14b   :  { %344 = vmatmul.bf16.vlgmr.msra.gmra.mxu2 %v267_v40 }
 0x1ce   :  { %v345_v42 = vpop.f32.mrf.mxu2 }
 0x1cf   :  { %v346_v43 = vadd.f32 %v509_v41, %v345_v42 }
 0x1d1   :  { %350 = vst [vmem:[#allocation10] sm:$0xff] %v346_v43 }
 0x1d6   :  { %v347_v44 = vpop.f32.mrf.mxu2 }
 0x1d7   :  { %v348_v45 = vadd.f32 %v509_v41, %v347_v44 }
 0x1d9   :  { %351 = vst [vmem:[#allocation10 + $0x8] sm:$0xff] %v348_v45 }
 0x1da   :  { %364 = dma.vmem_to_hbm [thread:$0]  %s357_s25, 256, %s359_s4, [#allocation4], %s645_s28, %s645_s28, %s646_s29  }
 0x1db   :  { %636 = dma.done.wait [#allocation4], 256  }
 0x1dc   :  { %637 = vsyncadd [#allocation4], 4294967040 }
 0x1dd   :  { %369 = vsyncpa [#allocation3], 1 }
 0x1de   :  { %370 = vsyncpa [#allocation6], 1 }
 0x1df   :  { %371 = vsyncpa [#allocation9], 1 }
 0x1e0   :  { %372 = vsyncpa [#allocation4], 1 }

// kernel: tpu_custom_call.1
= control target key start
LH: loop header
LB: loop body
LE: loop exit
PB: predicated region body
PF: predicated region fallthrough
CT: control target
= control target key end

     0   :  { %12 = vsyncpa [#allocation3], 0  ;;  %s711_s0 = inlined_call_operand.hbm [shape: bf16[16,128], index: 0, kind: input, shape index: {}]   ;;  %s712_s1 = inlined_call_operand.hbm [shape: bf16[128,128], index: 1, kind: input, shape index: {}]   ;;  %s713_s2 = inlined_call_operand.vmem [shape: f32[1,128], index: 2, kind: input, shape index: {}]   ;;  %s714_s3 = inlined_call_operand.hbm [shape: bf16[128,128], index: 3, kind: input, shape index: {}]   ;;  %s715_s4 = inlined_call_operand.vmem [shape: f32[1,128], index: 4, kind: input, shape index: {}]   ;;  %s716_s5 = inlined_call_operand.hbm [shape: bf16[128,128], index: 5, kind: input, shape index: {}]   ;;  %s717_s6 = inlined_call_operand.vmem [shape: f32[1,128], index: 6, kind: input, shape index: {}]   ;;  %s718_s7 = inlined_call_operand.hbm [shape: f32[16,128], index: 7, kind: output, shape index: {}]  }
   0x1   :  { %13 = vsyncpa [#allocation6], 0 }
   0x2   :  { %14 = vsyncpa [#allocation9], 0 }
   0x3   :  { %15 = vsyncpa [#allocation4], 0  ;;  %s33_s26 = sshll.u32 %s712_s1, 4  ;;  %s638_s27 = smov [#allocation5]   ;;  %s34_s26 = int_to_ptr.hbm [resolvable:$true] %s33_s26 }
   0x4   :  { %s35_s28 = sshll.u32 %s638_s27, 4  ;;  %s20_s8 = sshll.u32 %s711_s0, 4  ;;  %s36_s28 = int_to_ptr.vmem [resolvable:$true] %s35_s28  ;;  %s21_s8 = int_to_ptr.hbm [resolvable:$true] %s20_s8 }
   0x5   :  { %s639_s9 = smov 64   ;;  %s640_s10 = smov 4  }
   0x6   :  { %41 = dma.hbm_to_vmem [thread:$0]  %s34_s26, 1024, %s36_s28, [#allocation6], %s639_s9, %s639_s9, %s640_s10  }
   0x7   :  { %s641_s11 = smov [#allocation2]   ;;  %s48_s15 = sshll.u32 %s714_s3, 4  ;;  %s49_s15 = int_to_ptr.hbm [resolvable:$true] %s48_s15 }
   0x8   :  { %s22_s12 = sshll.u32 %s641_s11, 4  ;;  %s63_s17 = sshll.u32 %s716_s5, 4  ;;  %s23_s12 = int_to_ptr.vmem [resolvable:$true] %s22_s12  ;;  %s64_s17 = int_to_ptr.hbm [resolvable:$true] %s63_s17 }
   0x9   :  { %28 = dma.hbm_to_vmem [thread:$0]  %s21_s8, 128, %s23_s12, [#allocation3], %s639_s9, %s639_s9, %s640_s10  }
   0xa   :  { %s642_s18 = smov [#allocation7]   ;;  %s643_s0 = smov [#allocation8]  }
   0xb   :  { %s50_s19 = sshll.u32 %s642_s18, 4  ;;  %s65_s20 = sshll.u32 %s643_s0, 4  ;;  %s51_s19 = int_to_ptr.vmem [resolvable:$true] %s50_s19  ;;  %s66_s20 = int_to_ptr.vmem [resolvable:$true] %s65_s20 }
   0xc   :  { %56 = dma.hbm_to_vmem [thread:$0]  %s49_s15, 1024, %s51_s19, [#allocation6], %s639_s9, %s639_s9, %s640_s10  }
   0xd   :  { %71 = dma.hbm_to_vmem [thread:$0]  %s64_s17, 1024, %s66_s20, [#allocation9], %s639_s9, %s639_s9, %s640_s10  }
   0xe   :  { %630 = dma.done.wait [#allocation3], 128  }
   0xf   :  { %631 = vsyncadd [#allocation3], 4294967168 }
  0x10   :  { %632 = dma.done.wait [#allocation6], 2048  }
  0x11   :  { %633 = vsyncadd [#allocation6], 4294965248 }
  0x12   :  { %634 = dma.done.wait [#allocation9], 1024  }
  0x13   :  { %635 = vsyncadd [#allocation9], 4294966272  ;;  %v481_v0 = vld [vmem:[#allocation5 + $0x38] sm:$0xff]  ;;  %v480_v1 = vld [vmem:[#allocation5 + $0x30] sm:$0xff]  ;;  %s644_s24 = smov [#allocation10]   ;;  %s645_s28 = smov 128  }
  0x14   :  { %166 = vmatpush.bf16.msra.mxu0 %v481_v0  ;;  %v489_v2 = vld [vmem:[#allocation7 + $0x38] sm:$0xff]  ;;  %v488_v3 = vld [vmem:[#allocation7 + $0x30] sm:$0xff]  ;;  %v479_v4 = vld [vmem:[#allocation5 + $0x28] sm:$0xff]  ;;  %s356_s25 = sshll.u32 %s644_s24, 4  ;;  %s646_s29 = smov 8   ;;  %s357_s25 = int_to_ptr.vmem [resolvable:$true] %s356_s25 }
  0x15   :  { %251 = vmatpush.bf16.msra.mxu1 %v489_v2  ;;  %v487_v5 = vld [vmem:[#allocation7 + $0x28] sm:$0xff]  ;;  %v478_v6 = vld [vmem:[#allocation5 + $0x20] sm:$0xff]  ;;  %v477_v8 = vld [vmem:[#allocation5 + $0x18] sm:$0xff] }
  0x16   :  { %v486_v7 = vld [vmem:[#allocation7 + $0x20] sm:$0xff]  ;;  %v476_v9 = vld [vmem:[#allocation5 + $0x10] sm:$0xff]  ;;  %v475_v10 = vld [vmem:[#allocation5 + $0x8] sm:$0xff] }
  0x17   :  { %v474_v11 = vld [vmem:[#allocation5] sm:$0xff]  ;;  %v473_v12 = vld [vmem:[#allocation2] sm:$0xff]  ;;  %v484_v14 = vld [vmem:[#allocation7 + $0x10] sm:$0xff] }
  0x18   :  { %167 = vmatpush.bf16.msra.mxu0 %v480_v1  ;;  %v485_v13 = vld [vmem:[#allocation7 + $0x18] sm:$0xff]  ;;  %v483_v15 = vld [vmem:[#allocation7 + $0x8] sm:$0xff]  ;;  %v482_v16 = vld [vmem:[#allocation7] sm:$0xff] }
  0x19   :  { %252 = vmatpush.bf16.msra.mxu1 %v488_v3  ;;  %v497_v17 = vld [vmem:[#allocation8 + $0x38] sm:$0xff]  ;;  %v496_v18 = vld [vmem:[#allocation8 + $0x30] sm:$0xff]  ;;  %v495_v19 = vld [vmem:[#allocation8 + $0x28] sm:$0xff] }
  0x1a   :  { %336 = vmatpush.bf16.msra.mxu2 %v497_v17  ;;  %v494_v20 = vld [vmem:[#allocation8 + $0x20] sm:$0xff]  ;;  %v507_v22 = vld [vmem:[%s713_s2] ss:$0 sm:$0xff]  ;;  %v492_v30 = vld [vmem:[#allocation8 + $0x10] sm:$0xff] }
  0x1b   :  { %v493_v29 = vld [vmem:[#allocation8 + $0x18] sm:$0xff]  ;;  %v491_v31 = vld [vmem:[#allocation8 + $0x8] sm:$0xff]  ;;  %v490_v32 = vld [vmem:[#allocation8] sm:$0xff] }
  0x1c   :  { %168 = vmatpush.bf16.msra.mxu0 %v479_v4  ;;  %v508_v34 = vld [vmem:[%s715_s4] ss:$0 sm:$0xff]  ;;  %s358_s4 = sshll.u32 %s718_s7, 4  ;;  %s359_s4 = int_to_ptr.hbm [resolvable:$true] %s358_s4 }
  0x1d   :  { %253 = vmatpush.bf16.msra.mxu1 %v487_v5  ;;  %v509_v41 = vld [vmem:[%s717_s6] ss:$0 sm:$0xff] }
  0x1e   :  { %337 = vmatpush.bf16.msra.mxu2 %v496_v18 }
  0x20   :  { %169 = vmatpush.bf16.msra.mxu0 %v478_v6 }
  0x21   :  { %254 = vmatpush.bf16.msra.mxu1 %v486_v7 }
  0x22   :  { %338 = vmatpush.bf16.msra.mxu2 %v495_v19 }
  0x24   :  { %170 = vmatpush.bf16.msra.mxu0 %v477_v8 }
  0x25   :  { %255 = vmatpush.bf16.msra.mxu1 %v485_v13 }
  0x26   :  { %339 = vmatpush.bf16.msra.mxu2 %v494_v20 }
  0x28   :  { %171 = vmatpush.bf16.msra.mxu0 %v476_v9 }
  0x29   :  { %256 = vmatpush.bf16.msra.mxu1 %v484_v14 }
  0x2a   :  { %340 = vmatpush.bf16.msra.mxu2 %v493_v29 }
  0x2c   :  { %172 = vmatpush.bf16.msra.mxu0 %v475_v10 }
  0x2d   :  { %257 = vmatpush.bf16.msra.mxu1 %v483_v15 }
  0x2e   :  { %341 = vmatpush.bf16.msra.mxu2 %v492_v30 }
  0x30   :  { %173 = vmatpush.bf16.msra.mxu0 %v474_v11 }
  0x31   :  { %258 = vmatpush.bf16.msra.mxu1 %v482_v16 }
  0x32   :  { %342 = vmatpush.bf16.msra.mxu2 %v491_v31 }
  0x33   :  { %174 = vmatmul.bf16.vlgmr.msra.gmra.mxu0 %v473_v12 }
  0x36   :  { %343 = vmatpush.bf16.msra.mxu2 %v490_v32 }
  0xb0   :  { %v175_v21 = vpop.f32.mrf.mxu0 }
  0xb1   :  { %v176_v23 = vadd.f32 %v507_v22, %v175_v21 }
  0xb3   :  { %v180_v26 = vmax.f32 %v176_v23, 0.0 }
  0xb8   :  { %v177_v24 = vpop.f32.mrf.mxu0 }
  0xb9   :  { %v178_v25 = vadd.f32 %v507_v22, %v177_v24 }
  0xbb   :  { %v181_v27 = vmax.f32 %v178_v25, 0.0 }
  0xbd   :  { %v182_v28 = vpack.c.bf16 %v181_v27, %v180_v26 }
  0xbf   :  { %259 = vmatmul.bf16.vlgmr.msra.gmra.mxu1 %v182_v28 }
 0x13c   :  { %v260_v33 = vpop.f32.mrf.mxu1 }
 0x13d   :  { %v261_v35 = vadd.f32 %v508_v34, %v260_v33 }
 0x13f   :  { %v265_v38 = vmax.f32 %v261_v35, 0.0 }
 0x144   :  { %v262_v36 = vpop.f32.mrf.mxu1 }
 0x145   :  { %v263_v37 = vadd.f32 %v508_v34, %v262_v36 }
 0x147   :  { %v266_v39 = vmax.f32 %v263_v37, 0.0 }
 0x149   :  { %v267_v40 = vpack.c.bf16 %v266_v39, %v265_v38 }
 0x14b   :  { %344 = vmatmul.bf16.vlgmr.msra.gmra.mxu2 %v267_v40 }
 0x1ce   :  { %v345_v42 = vpop.f32.mrf.mxu2 }
 0x1cf   :  { %v346_v43 = vadd.f32 %v509_v41, %v345_v42 }
 0x1d1   :  { %350 = vst [vmem:[#allocation10] sm:$0xff] %v346_v43 }
 0x1d6   :  { %v347_v44 = vpop.f32.mrf.mxu2 }
 0x1d7   :  { %v348_v45 = vadd.f32 %v509_v41, %v347_v44 }
 0x1d9   :  { %351 = vst [vmem:[#allocation10 + $0x8] sm:$0xff] %v348_v45 }
 0x1da   :  { %364 = dma.vmem_to_hbm [thread:$0]  %s357_s25, 256, %s359_s4, [#allocation4], %s645_s28, %s645_s28, %s646_s29  }
 0x1db   :  { %636 = dma.done.wait [#allocation4], 256  }
 0x1dc   :  { %637 = vsyncadd [#allocation4], 4294967040 }
 0x1dd   :  { %369 = vsyncpa [#allocation3], 1 }
 0x1de   :  { %370 = vsyncpa [#allocation6], 1 }
 0x1df   :  { %371 = vsyncpa [#allocation9], 1 }
 0x1e0   :  { %372 = vsyncpa [#allocation4], 1 }

</bundles_post_ra>
